<compile_context>
chip_gen: v6e
topology: v6e:2x2x1
jax: 0.10.0
libtpu: 0.0.40
codegen_flags: <defaults>
</compile_context>

<pallas_src>
import functools

import jax
import jax.numpy as jnp
from jax.experimental import pallas as pl
from jax.experimental.pallas import tpu as pltpu

_LANE = 128


def _pick_spatial_tile(n_ch, hw, n_batch, itemsize,
                       vmem_budget_bytes=16 * 1024 * 1024,
                       min_grid_steps=8):
    """Pick a multiple-of-128 spatial tile (lanes) such that:
       * double-buffered x/y blocks + in-kernel f32 temporaries fit the budget,
       * the grid keeps >= min_grid_steps total steps when the problem allows
         (pipelining + megacore sharding on v7x),
       * otherwise the tile is as large as possible (amortize ~0.35 us/step).
    """
    if hw < _LANE:
        # Block last dim equals the full array dim (allowed); single step.
        return int(hw)
    # Per lane column: (x + y) double-buffered in the input dtype, plus ~2
    # single-buffered f32 full-tile temporaries (f32 copy / centered).
    per_lane = 4 * n_ch * itemsize + 2 * n_ch * 4
    budget_groups = max(1, (vmem_budget_bytes // per_lane) // _LANE)
    k = -(-hw // _LANE)                                  # 128-lane groups
    spatial_steps_wanted = max(1, -(-min_grid_steps // max(1, n_batch)))
    steps_groups = max(1, k // spatial_steps_wanted)
    t_groups = max(1, min(k, budget_groups, steps_groups))
    return int(t_groups * _LANE)


def _pono_kernel(x_ref, gamma_ref, beta_ref, y_ref, mean_ref, std_ref,
                 *, eps, inv_c, rnm1):
    # x_ref:               (1, C, T)   lane-dense spatial tile
    # gamma_ref/beta_ref:  (1, 1, T)   (re-fetched only when the tile changes)
    # y_ref:               (1, C, T)
    # mean_ref/std_ref:    (1, 1, T)
    x = x_ref[...].astype(jnp.float32)                   # no-op for f32 inputs

    # Two-pass statistics over the channel (sublane) axis — matches PyTorch.
    mean = jnp.sum(x, axis=1, keepdims=True) * jnp.float32(inv_c)   # (1,1,T)
    centered = x - mean                                              # (1,C,T)
    var = jnp.sum(centered * centered, axis=1, keepdims=True) * jnp.float32(rnm1)

    var_eps = var + jnp.float32(eps)
    inv_std = jax.lax.rsqrt(var_eps)                     # EUP, small tensor
    std = var_eps * inv_std                              # sqrt via one rsqrt

    scale = inv_std * gamma_ref[...].astype(jnp.float32)            # (1,1,T)
    beta = beta_ref[...].astype(jnp.float32)

    # Big tensor: one multiply + one add per element (broadcast over C).
    y_ref[...] = (centered * scale + beta).astype(y_ref.dtype)
    mean_ref[...] = mean.astype(mean_ref.dtype)
    std_ref[...] = std.astype(std_ref.dtype)


def pono(x, gamma=None, beta=None, eps=1e-5, spatial_tile=None):
    """Positional normalization.

    Args:
      x:     (N, C, H, W)
      gamma: (1, 1, H, W) or None (treated as ones)
      beta:  (1, 1, H, W) or None (treated as zeros)
    Returns:
      (y, mean, std) with shapes (N, C, H, W), (N, 1, H, W), (N, 1, H, W)
    """
    N, C, H, W = x.shape
    dtype = x.dtype
    itemsize = jnp.dtype(dtype).itemsize
    HW = H * W

    if gamma is None:
        gamma = jnp.ones((1, 1, H, W), dtype=dtype)
    if beta is None:
        beta = jnp.zeros((1, 1, H, W), dtype=dtype)

    # Flatten spatial dims to a lane-dense last axis (reshape = metadata only).
    x2 = x.reshape(N, C, HW)
    g2 = gamma.reshape(1, 1, HW)
    b2 = beta.reshape(1, 1, HW)

    if spatial_tile is None:
        tile = _pick_spatial_tile(C, HW, N, itemsize)
    else:
        tile = int(spatial_tile)

    num_spatial = pl.cdiv(HW, tile)
    # Spatial axis outermost, batch innermost: gamma/beta block index is
    # constant across consecutive steps -> fetched once per spatial tile.
    grid = (num_spatial, N)

    inv_c = 1.0 / C
    rnm1 = (1.0 / (C - 1)) if C > 1 else float("nan")    # PyTorch: NaN std @ C=1
    kernel = functools.partial(_pono_kernel, eps=float(eps), inv_c=inv_c, rnm1=rnm1)

    out_shapes = (
        jax.ShapeDtypeStruct((N, C, HW), dtype),
        jax.ShapeDtypeStruct((N, 1, HW), dtype),
        jax.ShapeDtypeStruct((N, 1, HW), dtype),
    )

    cost = pl.CostEstimate(
        flops=int(5 * N * C * HW + 4 * N * HW),
        transcendentals=int(N * HW),
        bytes_accessed=int(itemsize * (2 * N * C * HW + 2 * N * HW + 2 * HW)),
    )

    y2, mean2, std2 = pl.pallas_call(
        kernel,
        out_shape=out_shapes,
        grid_spec=pltpu.PrefetchScalarGridSpec(
            num_scalar_prefetch=0,
            grid=grid,
            in_specs=[
                pl.BlockSpec((1, C, tile), lambda s, n: (n, 0, s)),
                pl.BlockSpec((1, 1, tile), lambda s, n: (0, 0, s)),
                pl.BlockSpec((1, 1, tile), lambda s, n: (0, 0, s)),
            ],
            out_specs=[
                pl.BlockSpec((1, C, tile), lambda s, n: (n, 0, s)),
                pl.BlockSpec((1, 1, tile), lambda s, n: (n, 0, s)),
                pl.BlockSpec((1, 1, tile), lambda s, n: (n, 0, s)),
            ],
        ),
        compiler_params=pltpu.CompilerParams(
            dimension_semantics=("parallel", "parallel"),
            # Safe on v7x (64 MiB/TC) and leaves headroom on v5e/v6e (128 MiB);
            # blocks themselves target <= 16 MiB.
            vmem_limit_bytes=48 * 1024 * 1024,
        ),
        cost_estimate=cost,
    )(x2, g2, b2)

    y = y2.reshape(N, C, H, W)
    mean = mean2.reshape(N, 1, H, W)
    std = std2.reshape(N, 1, H, W)
    return y, mean, std


def pono_ref(x, gamma, beta, eps=1e-5):
    """Pure-JAX reference matching the PyTorch module."""
    x = x.astype(jnp.float32)
    C = x.shape[1]
    mean = jnp.mean(x, axis=1, keepdims=True)
    var = jnp.sum((x - mean) ** 2, axis=1, keepdims=True) / (C - 1)
    std = jnp.sqrt(var + eps)
    y = (x - mean) / std * gamma + beta
    return y, mean, std


if __name__ == "__main__":
    key = jax.random.PRNGKey(0)
    kx, kg, kb = jax.random.split(key, 3)
    N, C, H, W = 2, 4, 16, 16

    x = jax.random.normal(kx, (N, C, H, W), dtype=jnp.float32)
    # Module init is gamma=ones, beta=zeros; perturb slightly so the affine
    # path is actually exercised.
    gamma = 1.0 + 0.1 * jax.random.normal(kg, (1, 1, H, W), dtype=jnp.float32)
    beta = 0.1 * jax.random.normal(kb, (1, 1, H, W), dtype=jnp.float32)

    y, mean, std = pono(x, gamma, beta, eps=1e-5)
    jax.block_until_ready((y, mean, std))

    y_r, mean_r, std_r = pono_ref(x, gamma, beta, eps=1e-5)
    assert jnp.allclose(y, y_r, atol=1e-5, rtol=1e-5)
    assert jnp.allclose(mean, mean_r, atol=1e-5, rtol=1e-5)
    assert jnp.allclose(std, std_r, atol=1e-5, rtol=1e-5)

    print("KERNEL_OK")
</pallas_src>

<mosaic_0001>
module attributes {stable_mosaic.version = 11 : i64} {
  func.func @_pono_kernel(%arg0: i32, %arg1: i32, %arg2: memref<1x4x128xf32, #tpu.memory_space<vmem>>, %arg3: memref<1x1x128xf32, #tpu.memory_space<vmem>>, %arg4: memref<1x1x128xf32, #tpu.memory_space<vmem>>, %arg5: memref<1x4x128xf32, #tpu.memory_space<vmem>>, %arg6: memref<1x1x128xf32, #tpu.memory_space<vmem>>, %arg7: memref<1x1x128xf32, #tpu.memory_space<vmem>>) attributes {dimension_semantics = [#tpu.dimension_semantics<parallel>, #tpu.dimension_semantics<parallel>], iteration_bounds = array<i64: 2, 2>, scalar_prefetch = 0 : i64, scratch_operands = 0 : i64, tpu.core_type = #tpu.core_type<tc>, window_params = [{transform_indices = @transform_0, window_bounds = array<i64: 1, 4, 128>}, {transform_indices = @transform_1, window_bounds = array<i64: 1, 1, 128>}, {transform_indices = @transform_2, window_bounds = array<i64: 1, 1, 128>}, {transform_indices = @transform_3, window_bounds = array<i64: 1, 4, 128>}, {transform_indices = @transform_4, window_bounds = array<i64: 1, 1, 128>}, {transform_indices = @transform_5, window_bounds = array<i64: 1, 1, 128>}]} {
    %c0 = arith.constant 0 : index
    %c0_0 = arith.constant 0 : index
    %c0_1 = arith.constant 0 : index
    %0 = vector.load %arg2[%c0, %c0_0, %c0_1] : memref<1x4x128xf32, #tpu.memory_space<vmem>>, vector<1x4x128xf32>
    %cst = arith.constant dense<0.000000e+00> : vector<1x128xf32>
    %1 = vector.multi_reduction <add>, %0, %cst [1] : vector<1x4x128xf32> to vector<1x128xf32>
    %2 = vector.shape_cast %1 : vector<1x128xf32> to vector<1x1x128xf32>
    %cst_2 = arith.constant 2.500000e-01 : f32
    %3 = vector.broadcast %cst_2 : f32 to vector<1x1x128xf32>
    %4 = arith.mulf %2, %3 : vector<1x1x128xf32>
    %5 = vector.broadcast %4 : vector<1x1x128xf32> to vector<1x4x128xf32>
    %6 = arith.subf %0, %5 : vector<1x4x128xf32>
    %7 = arith.mulf %6, %6 : vector<1x4x128xf32>
    %cst_3 = arith.constant dense<0.000000e+00> : vector<1x128xf32>
    %8 = vector.multi_reduction <add>, %7, %cst_3 [1] : vector<1x4x128xf32> to vector<1x128xf32>
    %9 = vector.shape_cast %8 : vector<1x128xf32> to vector<1x1x128xf32>
    %cst_4 = arith.constant 0.333333343 : f32
    %10 = vector.broadcast %cst_4 : f32 to vector<1x1x128xf32>
    %11 = arith.mulf %9, %10 : vector<1x1x128xf32>
    %cst_5 = arith.constant 9.99999974E-6 : f32
    %12 = vector.broadcast %cst_5 : f32 to vector<1x1x128xf32>
    %13 = arith.addf %11, %12 : vector<1x1x128xf32>
    %14 = math.rsqrt %13 : vector<1x1x128xf32>
    %15 = arith.mulf %13, %14 : vector<1x1x128xf32>
    %c0_6 = arith.constant 0 : index
    %c0_7 = arith.constant 0 : index
    %c0_8 = arith.constant 0 : index
    %16 = vector.load %arg3[%c0_6, %c0_7, %c0_8] : memref<1x1x128xf32, #tpu.memory_space<vmem>>, vector<1x1x128xf32>
    %17 = arith.mulf %14, %16 : vector<1x1x128xf32>
    %c0_9 = arith.constant 0 : index
    %c0_10 = arith.constant 0 : index
    %c0_11 = arith.constant 0 : index
    %18 = vector.load %arg4[%c0_9, %c0_10, %c0_11] : memref<1x1x128xf32, #tpu.memory_space<vmem>>, vector<1x1x128xf32>
    %19 = vector.broadcast %17 : vector<1x1x128xf32> to vector<1x4x128xf32>
    %20 = arith.mulf %6, %19 : vector<1x4x128xf32>
    %21 = vector.broadcast %18 : vector<1x1x128xf32> to vector<1x4x128xf32>
    %22 = arith.addf %20, %21 : vector<1x4x128xf32>
    %c0_12 = arith.constant 0 : index
    %c0_13 = arith.constant 0 : index
    %c0_14 = arith.constant 0 : index
    %23 = vector.load %arg5[%c0_12, %c0_13, %c0_14] : memref<1x4x128xf32, #tpu.memory_space<vmem>>, vector<1x4x128xf32>
    tpu.vector_store %arg5[%c0_12, %c0_13, %c0_14], %22 {strides = array<i32>} : memref<1x4x128xf32, #tpu.memory_space<vmem>>, vector<1x4x128xf32>,
    %c0_15 = arith.constant 0 : index
    %c0_16 = arith.constant 0 : index
    %c0_17 = arith.constant 0 : index
    %24 = vector.load %arg6[%c0_15, %c0_16, %c0_17] : memref<1x1x128xf32, #tpu.memory_space<vmem>>, vector<1x1x128xf32>
    tpu.vector_store %arg6[%c0_15, %c0_16, %c0_17], %4 {strides = array<i32>} : memref<1x1x128xf32, #tpu.memory_space<vmem>>, vector<1x1x128xf32>,
    %c0_18 = arith.constant 0 : index
    %c0_19 = arith.constant 0 : index
    %c0_20 = arith.constant 0 : index
    %25 = vector.load %arg7[%c0_18, %c0_19, %c0_20] : memref<1x1x128xf32, #tpu.memory_space<vmem>>, vector<1x1x128xf32>
    tpu.vector_store %arg7[%c0_18, %c0_19, %c0_20], %15 {strides = array<i32>} : memref<1x1x128xf32, #tpu.memory_space<vmem>>, vector<1x1x128xf32>,
    return
  }
  func.func @transform_0(%arg0: i32, %arg1: i32) -> (i32, i32, i32) {
    %c0_i32 = arith.constant 0 : i32
    %c0_i32_0 = arith.constant 0 : i32
    return %arg1, %c0_i32, %arg0 : i32, i32, i32
  }
  func.func @transform_1(%arg0: i32, %arg1: i32) -> (i32, i32, i32) {
    %c0_i32 = arith.constant 0 : i32
    %c0_i32_0 = arith.constant 0 : i32
    %c0_i32_1 = arith.constant 0 : i32
    return %c0_i32, %c0_i32_0, %arg0 : i32, i32, i32
  }
  func.func @transform_2(%arg0: i32, %arg1: i32) -> (i32, i32, i32) {
    %c0_i32 = arith.constant 0 : i32
    %c0_i32_0 = arith.constant 0 : i32
    %c0_i32_1 = arith.constant 0 : i32
    return %c0_i32, %c0_i32_0, %arg0 : i32, i32, i32
  }
  func.func @transform_3(%arg0: i32, %arg1: i32) -> (i32, i32, i32) {
    %c0_i32 = arith.constant 0 : i32
    %c0_i32_0 = arith.constant 0 : i32
    return %arg1, %c0_i32, %arg0 : i32, i32, i32
  }
  func.func @transform_4(%arg0: i32, %arg1: i32) -> (i32, i32, i32) {
    %c0_i32 = arith.constant 0 : i32
    %c0_i32_0 = arith.constant 0 : i32
    return %arg1, %c0_i32, %arg0 : i32, i32, i32
  }
  func.func @transform_5(%arg0: i32, %arg1: i32) -> (i32, i32, i32) {
    %c0_i32 = arith.constant 0 : i32
    %c0_i32_0 = arith.constant 0 : i32
    return %arg1, %c0_i32, %arg0 : i32, i32, i32
  }
}

</mosaic_0001>

<bundles_post_ra>
// kernel: tpu_custom_call.1
= control target key start
LH: loop header
LB: loop body
LE: loop exit
PB: predicated region body
PF: predicated region fallthrough
CT: control target
= control target key end

     0   :  { %s1343_s0 = inlined_call_operand.hbm [shape: f32[2,4,256], index: 0, kind: input, shape index: {}]   ;;  %s1344_s1 = inlined_call_operand.hbm [shape: f32[1,1,256], index: 1, kind: input, shape index: {}]   ;;  %s1345_s2 = inlined_call_operand.vmem [shape: f32[1,1,256], index: 2, kind: input, shape index: {}]   ;;  %s1346_s3 = inlined_call_operand.hbm [shape: f32[2,4,256], index: 3, kind: output, shape index: {0}]   ;;  %s1347_s4 = inlined_call_operand.hbm [shape: f32[2,1,256], index: 4, kind: output, shape index: {1}]   ;;  %s1348_s5 = inlined_call_operand.hbm [shape: f32[2,1,256], index: 5, kind: output, shape index: {2}]  }
   0x1   :  { %1362 = sst [smem:[#allocation18_spill]] %s1345_s2 }
   0x2   :  { %1363 = sst [smem:[#allocation19_spill]] %s1346_s3 }
   0x3   :  { %1364 = sst [smem:[#allocation20_spill]] %s1347_s4 }
   0x4   :  { %1365 = sst [smem:[#allocation21_spill]] %s1348_s5 }
   0x5   :  { %11 = vsyncpa [#allocation3], 0 }
   0x6   :  { %13 = vsyncpa [#allocation3 + $0x1], 0 }
   0x7   :  { %14 = vsyncpa [#allocation6], 0 }
   0x8   :  { %16 = vsyncpa [#allocation6 + $0x1], 0 }
   0x9   :  { %17 = vsyncpa [#allocation4], 0 }
   0xa   :  { %19 = vsyncpa [#allocation4 + $0x1], 0 }
   0xb   :  { %20 = vsyncpa [#allocation9], 0 }
   0xc   :  { %22 = vsyncpa [#allocation9 + $0x1], 0  ;;  %s1005_s18 = smov 0   ;;  %s1007_s19 = smov 0  }
   0xd   :  { %s1009_s20 = smov 0   ;;  %s1011_s21 = smov 0  }
   0xe   :  { %s1013_s22 = smov 0   ;;  %s1015_s23 = smov 0  }
   0xf   :  { %s1017_s24 = smov 0   ;;  %s1019_s25 = smov 0  }
  0x10   :  { %s1021_s26 = smov 0   ;;  %s1023_s27 = smov 0  }
  0x11   :  { %s1025_s28 = smov 0  }
  0x12 LB: > { %1366 = sst [smem:[#allocation15_spill]] %s940_s21  ;;  %s1061_s29 = sadd.s32 4294967295, %s968_s28   ;;  %s968_s28 = sphi %s1025_s28, %s28_s28   ;;  %s964_s27 = sphi %s1023_s27, %s1404_s27   ;;  %s960_s26 = sphi %s1021_s26, %s1403_s26   ;;  %s956_s25 = sphi %s1019_s25, %s1402_s25   ;;  %s952_s24 = sphi %s1017_s24, %s1401_s24   ;;  %s948_s23 = sphi %s1015_s23, %s1400_s23   ;;  %s944_s22 = sphi %s1013_s22, %s1399_s22   ;;  %s940_s21 = sphi %s1011_s21, %s1398_s21   ;;  %s936_s20 = sphi %s1009_s20, %s1397_s20   ;;  %s932_s19 = sphi %s1007_s19, %s1396_s19   ;;  %s928_s18 = sphi %s1005_s18, %s1395_s18  }
  0x13   : > { %s1353_s30 = sadd.s32 4294967294, %s968_s28   ;;  %s37_s6 = sadd.s32 1, %s960_s26 }
  0x14   : > { %s40_s7 = sadd.s32 1, %s964_s27  ;;  %p38_p0 = scmp.ge.s32.totalorder %s37_s6, 2 }
  0x15   : > { %s49_s8 = sadd.s32 1, %s948_s23  ;;  %p56_p1 = scmp.ne.s32.totalorder %s948_s23, %s944_s22 }
  0x16   : > { %p1357_p2 = scmp.eq.s32.totalorder %s968_s28, 0  ;;  %s1406_s6 = smov (%p38_p0, %s37_s6), 0 }
  0x17   : > { %1367 = sst [smem:[#allocation16_spill]] %s1406_s6  ;;  %s1408_s7 = smov (!%p38_p0, %s40_s7), %s964_s27 }
  0x18   : > { %s44_s9 = ssub.s32 %s960_s26, %s1406_s6  ;;  %p1077_p3 = por %p1357_p2, %p56_p1 }
  0x19   : > { %p42_p4 = scmp.ge.s32.totalorder %s1408_s7, 2  ;;  %p62_p5 = scmp.ne.s32.totalorder %s944_s22, %s940_s21 }
  0x1a   : > { %p1356_p6 = scmp.eq.s32.totalorder %s1061_s29, 0  ;;  %p140_p7 = scmp.eq.s32.totalorder %s1061_s29, 3 }
  0x1b   : > { %s1410_s7 = smov (%p42_p4, %s1408_s7), 0  ;;  %p146_p10 = scmp.eq.s32.totalorder %s1353_s30, 3 }
  0x1c   : > { %1369 = sst [smem:[#allocation17_spill]] %s1410_s7  ;;  %p1089_p8 = por %p1356_p6, %p62_p5 }
  0x1d   : > { %p1093_p9 = por %p140_p7, %p56_p1  ;;  %s1099_s13 = ssub.s32 %s964_s27, %s1410_s7 }
  0x1e   : > { %s46_s14 = sor.u32 %s1099_s13, %s44_s9  ;;  %p1105_p13 = por %p146_p10, %p62_p5 }
  0x1f   : > { %s1371_s12 = scalar_select %p1093_p9, 1, 0 }
  0x20   : > { %p47_p12 = scmp.eq.s32.totalorder %s46_s14, 0  ;;  %p1358_p0 = scmp.lt.s32.totalorder %s968_s28, 4 }
  0x21   : > { %s1372_s15 = scalar_select %p1105_p13, 1, 0 }
  0x22   : > { %s1111_s16 = scalar_select %p47_p12, %s948_s23, %s49_s8  }
  0x23   : > { %s222_s17 = sand.u32 1, %s948_s23   ;;  %s597_s7 = sshll.u32 %s960_s26, 1 }
  0x24   : > { %s596_s6 = sshll.u32 %s222_s17, 2  ;;  %s231_s21 = sadd.s32 %s964_s27, %s597_s7 }
  0x25   : > { %s598_s3 = sshll.u32 %s231_s21, 6  ;;  %s226_s30 = scalar_lea.vmem [#allocation2], %s596_s6 }
  0x26   : > { %s235_s5 = sshll.u32 %s226_s30, 4  ;;  %s233_s4 = scalar_lea.hbm %s1343_s0, %s598_s3  ;;  %s236_s5 = int_to_ptr.vmem [resolvable:$true] %s235_s5 }
  0x27   : > { %p1123_p1 = pnand %p1358_p0, %p1077_p3  ;;  %p600_p4 = scmp.ge.s32.totalorder %s968_s28, 1 }
  0x28   : > { %p263_p5 = scmp.lt.s32.totalorder %s968_s28, 5  ;;  %s223_s8 = scalar_lea.sflag [#allocation3], %s222_s17 }
  0x29   : > { %p734_p7 = pneg %p1123_p1  ;;  %s745_s21 = scalar_lea.vmem %s236_s5, 64 }
  0x2a   : > { %p746_p10 = scmp.ne.s32.totalorder %s236_s5, %s745_s21  ;;  %s970_s30 = smov [#allocation2]  }
  0x2b   : > { %s750_s2 = sshll.u32 %s970_s30, 4  ;;  %s751_s2 = int_to_ptr.vmem [resolvable:$false] %s750_s2 }
  0x2c   : > { %p748_p12 = pnand %p746_p10, %p734_p7  ;;  %s752_s3 = scalar_lea.vmem %s751_s2, 128 }
  0x2d   : > { %p753_p2 = scmp.lt.s32.totalorder %s236_s5, %s751_s2  ;;  %p754_p11 = scmp.lt.s32.totalorder %s752_s3, %s745_s21 }
  0x2e   : > { %p749_p6 = pneg %p748_p12 }
  0x2f   : > { %p755_p3 = por %p754_p11, %p753_p2 }
  0x31   : > { %p756_p0 = pnand %p755_p3, %p749_p6 }
  0x33   : > { %759 = shalt.err (!%p756_p0)
}
  0x34   : > { %626 = dma.hbm_to_vmem [thread:$0]  (!%p1123_p1), %s233_s4, 64, %s236_s5, %s223_s8  }
  0x35   : > { %p1137_p2 = pnand %p600_p4, %p263_p5  ;;  %s75_s7 = sadd.s32 1, %s936_s20 }
  0x36   : > { %p1375_p6 = scmp.eq.s32.totalorder %s1099_s13, 0  ;;  %p82_p11 = scmp.ne.s32.totalorder %s936_s20, %s932_s19 }
  0x37   : > { %p88_p0 = scmp.ne.s32.totalorder %s932_s19, %s928_s18  ;;  %s242_s17 = sand.u32 1, %s936_s20  }
  0x38   : > { %s1145_s10 = scalar_select %p1375_p6, %s936_s20, %s75_s7  }
  0x39   : > { %s599_s9 = sshll.u32 %s964_s27, 4  ;;  %p1376_p7 = scmp.eq.s32.totalorder %s968_s28, 0 }
  0x3a   : > { %p1377_p12 = scmp.eq.s32.totalorder %s1061_s29, 0  ;;  %s250_s8 = scalar_lea.hbm %s1344_s1, %s599_s9 }
  0x3b   : > { %p84_p10 = por %p82_p11, %p1376_p7  ;;  %s245_s21 = scalar_lea.vmem [#allocation5], %s242_s17 }
  0x3c   : > { %p1157_p3 = por %p88_p0, %p1377_p12  ;;  %s252_s30 = sshll.u32 %s245_s21, 4  ;;  %s253_s30 = int_to_ptr.vmem [resolvable:$true] %s252_s30 }
  0x3d   : > { %p1379_p1 = scmp.lt.s32.totalorder %s968_s28, 4  ;;  %s243_s18 = scalar_lea.sflag [#allocation6], %s242_s17 }
  0x3e   : > { %s773_s2 = scalar_lea.vmem %s253_s30, 16  ;;  %s971_s3 = smov [#allocation5]  }
  0x3f   : > { %p1166_p4 = pnand %p1379_p1, %p84_p10  ;;  %p774_p6 = scmp.ne.s32.totalorder %s253_s30, %s773_s2 }
  0x40   : > { %s778_s7 = sshll.u32 %s971_s3, 4  ;;  %s779_s7 = int_to_ptr.vmem [resolvable:$false] %s778_s7 }
  0x41   : > { %p762_p5 = pneg %p1166_p4  ;;  %s780_s9 = scalar_lea.vmem %s779_s7, 32 }
  0x42   : > { %p781_p7 = scmp.lt.s32.totalorder %s253_s30, %s779_s7  ;;  %p782_p12 = scmp.lt.s32.totalorder %s780_s9, %s773_s2 }
  0x43   : > { %p776_p11 = pnand %p774_p6, %p762_p5 }
  0x44   : > { %p783_p13 = por %p782_p12, %p781_p7 }
  0x45   : > { %p777_p0 = pneg %p776_p11 }
  0x47   : > { %p784_p9 = pnand %p783_p13, %p777_p0 }
  0x49   : > { %787 = shalt.err (!%p784_p9)
}
  0x4a   : > { %629 = dma.hbm_to_vmem [thread:$0]  (!%p1166_p4), %s250_s8, 16, %s253_s30, %s243_s18  }
  0x4b   : > { %267 = sbr.rel (%p1137_p2) target bundleno = 183 (0xb7), region = 32  ;;  %s1177_s17 = sand.u32 (!%p1137_p2), 1, %s944_s22  }
  0x4c   : > { %s1360_s4 = sshll.u32 (!%p1137_p2), %s1177_s17, 2  ;;  %s270_s5 = scalar_lea.sflag (!%p1137_p2), [#allocation3], %s1177_s17 }
  0x4d   : > { %s273_s21 = scalar_lea.vmem (!%p1137_p2), [#allocation2], %s1360_s4 }
  0x50   : > { %911 = dma.done.wait (%p1089_p8), %s270_s5, 64  }
  0x51   : > { %913 = vsyncadd (%p1089_p8), %s270_s5, 4294967232  ;;  %s278_s6 = sand.u32 1, %s932_s19  }
  0x52   : > { %s279_s8 = scalar_lea.sflag [#allocation6], %s278_s6  ;;  %s1188_s30 = scalar_lea.vmem [#allocation5], %s278_s6 }
  0x53   : > { %915 = dma.done.wait (%p1157_p3), %s279_s8, 16  }
  0x54   : > { %917 = vsyncadd (%p1157_p3), %s279_s8, 4294967280  ;;  %vm327_vm0 = vcmask 1043456   ;;  %v326_v0 = vld [vmem:[%s273_s21] sm:$0xf]  ;;  %s605_s11 = sshll.u32 %s952_s24, 1  ;;  %s316_s14 = scalar_lea.vmem [#allocation8], %s1177_s17 }
  0x55   : > { %v328_v1 = vsel %vm327_vm0, %v326_v0, 0.0  ;;  %s1197_s13 = sadd.s32 %s956_s25, %s605_s11  ;;  %s406_s18 = sshll.u32 %s316_s14, 4  ;;  %s1202_s18 = int_to_ptr.vmem [resolvable:$true] %s406_s18 }
  0x56   : > { %v329_v2 = vrot.slane %v328_v1, 4  ;;  %s372_s2 = sand.u32 1, %s1061_s29   ;;  %s1361_s3 = sshll.u32 %s1197_s13, 4 }
  0x57   : > { %s1381_s9 = sld [smem:[#allocation20_spill]]  ;;  %s1211_s21 = scalar_lea.sflag [#allocation9], %s372_s2 }
  0x58   : > { %v330_v3 = vadd.f32 %v329_v2, %v328_v1  ;;  %s788_s6 = scalar_lea.vmem %s1202_s18, 16  ;;  %p1382_p9 = scmp.ne.s32.totalorder %s1371_s12, 0 }
  0x59   : > { %p789_p8 = scmp.ne.s32.totalorder %s1202_s18, %s788_s6  ;;  %s972_s29 = smov [#allocation8]  }
  0x5a   : > { %v331_v4 = vrot.slane %v330_v3, 2  ;;  %s792_s8 = sshll.u32 %s972_s29, 4  ;;  %s793_s8 = int_to_ptr.vmem [resolvable:$false] %s792_s8 }
  0x5b   : > { %p790_p13 = pnand %p789_p8, %p1382_p9  ;;  %s794_s11 = scalar_lea.vmem %s793_s8, 32 }
  0x5c   : > { %v332_v5 = vadd.f32 %v331_v4, %v330_v3  ;;  %p795_p10 = scmp.lt.s32.totalorder %s1202_s18, %s793_s8  ;;  %p796_p3 = scmp.lt.s32.totalorder %s794_s11, %s788_s6 }
  0x5d   : > { %s404_s5 = scalar_lea.hbm %s1381_s9, %s1361_s3  ;;  %p791_p2 = pneg %p790_p13 }
  0x5e   : > { %v333_v6 = vrot.slane %v332_v5, 1  ;;  %p797_p1 = por %p796_p3, %p795_p10 }
  0x60   : > { %v334_v7 = vadd.f32 %v333_v6, %v332_v5  ;;  %p798_p4 = pnand %p797_p1, %p791_p2 }
  0x62   : > { %v335_v8 = vmul.f32 0.25, %v334_v7 }
  0x64   : > { %v1209_v9 = vsub.f32 %v326_v0, %v335_v8  ;;  %365 = vst [vmem:[%s316_s14] sm:$0x1] %v335_v8 }
  0x65   : > { %801 = shalt.err (!%p798_p4)
}
  0x66   : > { %s802_s24 = scalar_lea.hbm %s404_s5, 16  ;;  %s806_s7 = scalar_lea.hbm %s1381_s9, 64 }
  0x67   : > { %p803_p5 = scmp.ne.s32.totalorder %s404_s5, %s802_s24  ;;  %p807_p0 = scmp.lt.s32.totalorder %s404_s5, %s1381_s9 }
  0x68   : > { %p808_p7 = scmp.lt.s32.totalorder %s806_s7, %s802_s24 }
  0x69   : > { %p804_p6 = pnand %p803_p5, %p1382_p9 }
  0x6a   : > { %p809_p12 = por %p808_p7, %p807_p0 }
  0x6b   : > { %p805_p11 = pneg %p804_p6 }
  0x6d   : > { %p810_p8 = pnand %p809_p12, %p805_p11 }
  0x6f   : > { %813 = shalt.err (!%p810_p8)
}
  0x70   : > { %618 = dma.vmem_to_hbm [thread:$0]  (%p1382_p9), %s1202_s18, 16, %s404_s5, %s1211_s21   ;;  %v337_v10 = vmul.f32 %v1209_v9, %v1209_v9  ;;  %v352_v20 = vlaneseq  ;;  %v349_v22 = vld [vmem:[%s1188_s30] sm:$0x1] }
  0x71   : > { %p323_p13 = scmp.lt.s32.totalorder %s956_s25, 1  ;;  %s322_s4 = scalar_lea.vmem [#allocation10], %s1177_s17 }
  0x72   : > { %v338_v11 = vsel %vm327_vm0, %v337_v10, 0.0  ;;  %v353_v21 = vshrl.u32 %v352_v20, 7  ;;  %s421_s18 = sshll.u32 %s322_s4, 4  ;;  %s1383_s6 = sld [smem:[#allocation18_spill]]  ;;  %s1240_s18 = int_to_ptr.vmem [resolvable:$true] %s421_s18 }
  0x73   : > { %v339_v12 = vrot.slane %v338_v11, 4  ;;  %s1412_s25 = smov (!%p323_p13, %s956_s25), 1  ;;  %s1384_s8 = sshll.u32 %s1197_s13, 4 }
  0x74   : > { %v354_v23 = vsub.s32 0, %v353_v21  ;;  %s1385_s14 = sld [smem:[#allocation21_spill]]  ;;  %s1386_s2 = sshll.u32 %s1177_s17, 2 }
  0x75   : > { %v340_v13 = vadd.f32 %v339_v12, %v338_v11  ;;  %s1251_s7 = scalar_lea.vmem [#allocation7], %s1386_s2  ;;  %s814_s5 = scalar_lea.vmem %s1240_s18, 16 }
  0x76   : > { %s391_s3 = sshll.u32 %s1251_s7, 4  ;;  %p815_p2 = scmp.ne.s32.totalorder %s1240_s18, %s814_s5  ;;  %s1279_s3 = int_to_ptr.vmem [resolvable:$true] %s391_s3 }
  0x77   : > { %v341_v14 = vrot.slane %v340_v13, 2 }
  0x78   : > { %s325_s29 = scalar_lea.vmem %s1383_s6, %s1412_s25  ;;  %p816_p10 = pnand %p815_p2, %p1382_p9 }
  0x79   : > { %v342_v15 = vadd.f32 %v341_v14, %v340_v13  ;;  %v603_v28 = vld [vmem:[%s325_s29] ss:$0 sm:$0xff]  ;;  %s973_s6 = smov [#allocation10]  }
  0x7a   : > { %s1247_s30 = scalar_lea.hbm %s1385_s14, %s1384_s8  ;;  %p817_p3 = pneg %p816_p10 }
  0x7b   : > { %v343_v16 = vrot.slane %v342_v15, 1  ;;  %s818_s11 = sshll.u32 %s973_s6, 4  ;;  %s819_s11 = int_to_ptr.vmem [resolvable:$false] %s818_s11 }
  0x7c   : > { %s820_s24 = scalar_lea.vmem %s819_s11, 32  ;;  %p821_p1 = scmp.lt.s32.totalorder %s1240_s18, %s819_s11 }
  0x7d   : > { %v344_v17 = vadd.f32 %v343_v16, %v342_v15  ;;  %p822_p4 = scmp.lt.s32.totalorder %s820_s24, %s814_s5 }
  0x7f   : > { %v345_v18 = vmul.f32 0.33333334, %v344_v17  ;;  %p823_p5 = por %p822_p4, %p821_p1 }
  0x81   : > { %v346_v19 = vadd.f32 1e-05, %v345_v18  ;;  %p824_p6 = pnand %p823_p5, %p817_p3 }
  0x83   : > { %730 = vrsqrt.f32 %v346_v19 }
  0x90   : > { %v731_v24 = vpop.eup %730 }
  0x91   : > { %v350_v25 = vmul.f32 %v731_v24, %v349_v22  ;;  %v348_v26 = vmul.f32 %v731_v24, %v346_v19 }
  0x93   : > { %v355_v27 = vrot.slane %v350_v25, %v354_v23  ;;  %366 = vst [vmem:[%s322_s4] sm:$0x1] %v348_v26 }
  0x94   : > { %827 = shalt.err (!%p824_p6)
}
  0x95   : > { %s828_s4 = scalar_lea.hbm %s1247_s30, 16  ;;  %s832_s2 = scalar_lea.hbm %s1385_s14, 64 }
  0x96   : > { %p829_p11 = scmp.ne.s32.totalorder %s1247_s30, %s828_s4  ;;  %p833_p12 = scmp.lt.s32.totalorder %s1247_s30, %s1385_s14 }
  0x97   : > { %p834_p8 = scmp.lt.s32.totalorder %s832_s2, %s828_s4 }
  0x98   : > { %p830_p0 = pnand %p829_p11, %p1382_p9 }
  0x99   : > { %p835_p13 = por %p834_p8, %p833_p12 }
  0x9a   : > { %p831_p7 = pneg %p830_p0 }
  0x9c   : > { %p836_p2 = pnand %p835_p13, %p831_p7 }
  0x9e   : > { %839 = shalt.err (!%p836_p2)
}
  0x9f   : > { %619 = dma.vmem_to_hbm [thread:$0]  (%p1382_p9), %s1240_s18, 16, %s1247_s30, %s1211_s21   ;;  %v356_v29 = vmul.f32 %v355_v27, %v1209_v9 }
  0xa0   : > { %s1387_s25 = sshll.u32 %s1197_s13, 6  ;;  %s1388_s24 = sld [smem:[#allocation19_spill]] }
  0xa1   : > { %v363_v30 = vadd.f32 %v603_v28, %v356_v29  ;;  %s368_s8 = scalar_lea.sflag [#allocation4], %s1177_s17  ;;  %s840_s2 = scalar_lea.vmem %s1279_s3, 64 }
  0xa2   : > { %p841_p10 = scmp.ne.s32.totalorder %s1279_s3, %s840_s2  ;;  %s974_s21 = smov [#allocation7]  }
  0xa3   : > { %364 = vst [vmem:[%s1251_s7] sm:$0xf] %v363_v30  ;;  %s844_s18 = sshll.u32 %s974_s21, 4  ;;  %s845_s18 = int_to_ptr.vmem [resolvable:$false] %s844_s18 }
  0xa4   : > { %p842_p3 = pnand %p841_p10, %p1382_p9  ;;  %s846_s30 = scalar_lea.vmem %s845_s18, 128 }
  0xa5   : > { %p847_p4 = scmp.lt.s32.totalorder %s1279_s3, %s845_s18  ;;  %p848_p5 = scmp.lt.s32.totalorder %s846_s30, %s840_s2 }
  0xa6   : > { %s1389_s4 = smov %s1388_s24  ;;  %s389_s29 = scalar_lea.hbm %s1388_s24, %s1387_s25 }
  0xa7   : > { %p843_p1 = pneg %p842_p3  ;;  %p849_p6 = por %p848_p5, %p847_p4 }
  0xa9   : > { %p850_p11 = pnand %p849_p6, %p843_p1 }
  0xab   : > { %853 = shalt.err (!%p850_p11)
}
  0xac   : > { %s854_s13 = scalar_lea.hbm %s389_s29, 64  ;;  %s858_s6 = scalar_lea.hbm %s1389_s4, 256 }
  0xad   : > { %p855_p0 = scmp.ne.s32.totalorder %s389_s29, %s854_s13  ;;  %p859_p8 = scmp.lt.s32.totalorder %s389_s29, %s1389_s4 }
  0xae   : > { %p860_p13 = scmp.lt.s32.totalorder %s858_s6, %s854_s13 }
  0xaf   : > { %p856_p7 = pnand %p855_p0, %p1382_p9 }
  0xb0   : > { %p861_p2 = por %p860_p13, %p859_p8 }
  0xb1   : > { %p857_p12 = pneg %p856_p7 }
  0xb3   : > { %p862_p10 = pnand %p861_p2, %p857_p12 }
  0xb5   : > { %865 = shalt.err (!%p862_p10)
}
  0xb6   : > { %617 = dma.vmem_to_hbm [thread:$0]  (%p1382_p9), %s1279_s3, 64, %s389_s29, %s368_s8  }
  0xb7 PF: > { %s1390_s11 = sld [smem:[#allocation15_spill]]  ;;  %p641_p3 = scmp.ge.s32.totalorder %s968_s28, 2 }
  0xb8   : > { %p1391_p1 = scmp.ne.s32.totalorder %s1372_s15, 0 }
  0xba   : > { %p631_p4 = pnand %p641_p3, %p1391_p1 }
  0xbc   : > { %p632_p5 = pneg %p631_p4 }
  0xbd   : > { %s433_s24 = sand.u32 1, %s1390_s11  }
  0xbe   : > { %s434_s2 = scalar_lea.sflag [#allocation4], %s433_s24 }
  0xbf   : > { %919 = dma.done.wait (%p632_p5), %s434_s2, 64  }
  0xc0   : > { %921 = vsyncadd (%p632_p5), %s434_s2, 4294967232  ;;  %s1392_s21 = sadd.s32 4294967294, %s968_s28  }
  0xc1   : > { %s442_s18 = sand.u32 1, %s1392_s21  }
  0xc2   : > { %s443_s30 = scalar_lea.sflag [#allocation9], %s442_s18 }
  0xc3   : > { %923 = dma.done.wait (%p632_p5), %s443_s30, 32  }
  0xc4   : > { %925 = vsyncadd (%p632_p5), %s443_s30, 4294967264  ;;  %s28_s28 = sadd.s32 1, %s968_s28   ;;  %s1393_s12 = sld [smem:[#allocation16_spill]] }
  0xc5   : > { %p25_p9 = scmp.ge.s32.totalorder %s28_s28, 6   ;;  %s1394_s15 = sld [smem:[#allocation17_spill]] }
  0xc6   : > { %s1395_s18 = smov %s932_s19  ;;  %s1396_s19 = smov %s936_s20 }
  0xc7   : > { %s1397_s20 = smov %s1145_s10  ;;  %s1398_s21 = smov %s944_s22 }
  0xc8   : > { %s1399_s22 = smov %s948_s23  ;;  %s1400_s23 = smov %s1111_s16 }
  0xc9   : > { %s1401_s24 = smov %s960_s26  ;;  %s1402_s25 = smov %s964_s27 }
  0xca   : > { %s1403_s26 = smov %s1393_s12  ;;  %27 = sbr.rel (!%p25_p9) target bundleno = 18 (0x12), region = 125 }
  0xcb   : > { %s1404_s27 = smov %s1394_s15 }
  0xcf   :  { %455 = vsyncpa [#allocation3], 1 }
  0xd0   :  { %457 = vsyncpa [#allocation3 + $0x1], 1 }
  0xd1   :  { %458 = vsyncpa [#allocation6], 1 }
  0xd2   :  { %460 = vsyncpa [#allocation6 + $0x1], 1 }
  0xd3   :  { %461 = vsyncpa [#allocation4], 1 }
  0xd4   :  { %463 = vsyncpa [#allocation4 + $0x1], 1 }
  0xd5   :  { %464 = vsyncpa [#allocation9], 1 }
  0xd6   :  { %466 = vsyncpa [#allocation9 + $0x1], 1 }

</bundles_post_ra>
